<compile_context>
chip_gen: v7x
topology: tpu7x:2x2x1
jax: 0.10.0
libtpu: 0.0.40
codegen_flags: <defaults>
</compile_context>

<pallas_src>
import functools
import math

import jax
import jax.numpy as jnp
from jax import lax
from jax.experimental import pallas as pl
from jax.experimental.pallas import tpu as pltpu


def _patch_embed_kernel(x_ref, w_ref, pe_ref, o_ref, *, sb, compute_dtype):
    # x_ref : (SB, TP, patch_len) f32     -- SB sequences x TP patches per step
    # w_ref : (patch_len, d_model)        -- Linear weight (transposed), resident
    # pe_ref: (TP, d_model) f32           -- positional-embedding rows for block
    # o_ref : (SB, TP, d_model) out_dtype
    w = w_ref[...]
    pe = pe_ref[...]

    def body(s, carry):
        xs = x_ref[s]                       # (TP, patch_len), streamed f32
        if xs.dtype != compute_dtype:
            xs = xs.astype(compute_dtype)   # in-kernel cast, hidden under output DMA
        y = jnp.dot(xs, w, preferred_element_type=jnp.float32)
        o_ref[s] = (y + pe).astype(o_ref.dtype)
        return carry

    lax.fori_loop(0, sb, body, 0, unroll=sb <= 8)


def positional_embedding(d_model, max_len=5000, dtype=jnp.float32):
    """Matches PositionalEmbedding buffer `pe` (shape (max_len, d_model))."""
    position = jnp.arange(max_len, dtype=jnp.float32)[:, None]
    div_term = jnp.exp(
        jnp.arange(0, d_model, 2, dtype=jnp.float32) * -(math.log(10000.0) / d_model)
    )
    ang = position * div_term  # (max_len, ceil(d_model/2))
    pe = jnp.zeros((max_len, d_model), dtype=jnp.float32)
    pe = pe.at[:, 0::2].set(jnp.sin(ang))
    pe = pe.at[:, 1::2].set(jnp.cos(ang)[:, : d_model // 2])  # handles odd d_model
    return pe.astype(dtype)


def patch_embedding_forward(x, w, pe_full, patch_len, stride, padding, *,
                            compute_dtype=jnp.float32, out_dtype=jnp.float32):
    """Replicates PatchEmbedding.forward (eval mode).

    x       : (B, n_vars, L) float32
    w       : (d_model, patch_len)  -- nn.Linear weight (PyTorch convention)
    pe_full : (max_len, d_model)    -- PositionalEmbedding buffer
    returns (out, n_vars) with out: (B*n_vars, num_patches, d_model) out_dtype
    """
    B, n_vars, L = x.shape
    d_model = w.shape[0]

    # --- glue: ReplicationPad1d((0, padding)) -------------------------------
    x_pad = jnp.concatenate(
        [x, jnp.broadcast_to(x[..., -1:], (B, n_vars, padding))], axis=-1
    )  # (B, n_vars, L + padding)
    Lp = L + padding

    # --- glue: unfold(dim=-1, size=patch_len, step=stride) ------------------
    num_patches = (Lp - patch_len) // stride + 1
    if num_patches > pe_full.shape[0]:
        raise ValueError("num_patches exceeds positional-embedding max_len")

    if stride == patch_len and Lp == num_patches * patch_len:
        # Non-overlapping patches: pure reshape, no gather.
        patches = x_pad.reshape(B, n_vars, num_patches, patch_len)
    else:
        idx = stride * jnp.arange(num_patches)[:, None] + jnp.arange(patch_len)[None, :]
        patches = x_pad[..., idx]  # (B, n_vars, num_patches, patch_len)

    BN = B * n_vars
    patches = patches.reshape(BN, num_patches, patch_len)  # stays f32; cast in-kernel

    w_t = w.T.astype(compute_dtype)                    # (patch_len, d_model)
    pe = pe_full[:num_patches, :].astype(jnp.float32)  # (num_patches, d_model)

    out_isz = jnp.dtype(out_dtype).itemsize
    cmp_isz = jnp.dtype(compute_dtype).itemsize

    # --- tile sizing ---------------------------------------------------------
    # Patch-axis tile: full axis when it fits; otherwise a multiple of 8
    # (ragged tail handled by the cdiv grid + masked writeback).
    TP = num_patches if num_patches <= 1024 else 1024
    # Sequence-axis tile: target ~4 MiB of output per step (2-4k rows for
    # d_model=512) to amortize the ~0.35 us per-step overhead while staying
    # inside v5e's 16 MiB scoped-VMEM default once double-buffered.
    target_rows = max(8, min(4096, (4 * 1024 * 1024) // max(1, d_model * out_isz)))
    SB = max(1, min(BN, target_rows // max(1, TP)))

    def _blk_bytes(sb):
        # VMEM footprint of the pipelined blocks, including (8,128) layout padding.
        rows = -(-TP // 8) * 8
        d_pad = -(-d_model // 128) * 128
        p_pad = -(-patch_len // 128) * 128
        x_b = sb * rows * p_pad * 4
        o_b = sb * rows * d_pad * out_isz
        pe_b = rows * d_pad * 4
        w_b = (-(-patch_len // 8) * 8) * d_pad * cmp_isz
        return 2 * (x_b + o_b + pe_b) + 2 * w_b  # double-buffered

    while SB > 1 and _blk_bytes(SB) > 24 * 1024 * 1024:
        SB = max(1, SB // 2)

    grid_s = -(-BN // SB)
    grid_p = -(-num_patches // TP)
    # Never collapse to a single grid step when avoidable: keeps both TensorCores
    # and the DMA double-buffer busy.
    if grid_s * grid_p == 1 and BN > 1:
        SB = -(-BN // 2)
        grid_s = -(-BN // SB)

    vmem_limit = int(min(64 * 1024 * 1024,
                         max(32 * 1024 * 1024, _blk_bytes(SB) * 3 // 2)))

    kernel = functools.partial(_patch_embed_kernel, sb=SB, compute_dtype=compute_dtype)

    out = pl.pallas_call(
        kernel,
        out_shape=jax.ShapeDtypeStruct((BN, num_patches, d_model), out_dtype),
        grid=(grid_s, grid_p),
        in_specs=[
            pl.BlockSpec((SB, TP, patch_len), lambda s, p: (s, p, 0)),
            pl.BlockSpec((patch_len, d_model), lambda s, p: (0, 0)),   # resident weight
            pl.BlockSpec((TP, d_model), lambda s, p: (p, 0)),          # PE rows for block
        ],
        out_specs=pl.BlockSpec((SB, TP, d_model), lambda s, p: (s, p, 0)),
        compiler_params=pltpu.CompilerParams(
            dimension_semantics=("parallel", "parallel"),
            vmem_limit_bytes=vmem_limit,
        ),
    )(patches, w_t, pe)

    # dropout: identity in eval mode
    return out, n_vars


if __name__ == "__main__":
    # Small, deterministic config consistent with the module.
    B, n_vars, L = 2, 4, 16
    d_model, patch_len, stride, padding = 32, 8, 8, 8
    dropout_p = 0.1  # unused at inference

    key = jax.random.PRNGKey(0)
    kx, kw = jax.random.split(key)
    x = jax.random.normal(kx, (B, n_vars, L), dtype=jnp.float32)
    # nn.Linear(patch_len, d_model, bias=False) weight: (d_model, patch_len)
    bound = 1.0 / math.sqrt(patch_len)
    w = jax.random.uniform(
        kw, (d_model, patch_len), minval=-bound, maxval=bound, dtype=jnp.float32
    )
    pe_full = positional_embedding(d_model)

    # Default path: f32 compute + f32 output (bit-parity with the PyTorch module).
    out, nv = patch_embedding_forward(x, w, pe_full, patch_len, stride, padding)
    out = jax.block_until_ready(out)

    # Pure-JAX f32 reference.
    x_pad = jnp.concatenate(
        [x, jnp.broadcast_to(x[..., -1:], (B, n_vars, padding))], axis=-1
    )
    num_patches = (L + padding - patch_len) // stride + 1
    patches_ref = x_pad.reshape(B * n_vars, num_patches, patch_len)
    ref = (
        jnp.einsum("npl,dl->npd", patches_ref, w, precision="highest")
        + pe_full[None, :num_patches, :]
    )

    assert nv == n_vars
    assert out.shape == (B * n_vars, num_patches, d_model)
    assert out.dtype == jnp.float32
    assert jnp.allclose(out, ref, atol=1e-4, rtol=1e-4), "f32 mismatch vs reference"

    # Perf knob from the review: bf16 output + bf16 matmul halves the
    # store-bound HBM traffic when the consumer tolerates bf16.
    out_bf, _ = patch_embedding_forward(
        x, w, pe_full, patch_len, stride, padding,
        compute_dtype=jnp.bfloat16, out_dtype=jnp.bfloat16,
    )
    out_bf = jax.block_until_ready(out_bf)
    assert out_bf.dtype == jnp.bfloat16
    assert jnp.allclose(out_bf.astype(jnp.float32), ref, atol=5e-2, rtol=5e-2), \
        "bf16 mismatch vs reference"

    print("KERNEL_OK")
</pallas_src>

<mosaic_0001>
module attributes {stable_mosaic.version = 11 : i64} {
  func.func @_patch_embed_kernel(%arg0: i32, %arg1: i32, %arg2: memref<4x3x8xf32, #tpu.memory_space<vmem>>, %arg3: memref<8x32xf32, #tpu.memory_space<vmem>>, %arg4: memref<3x32xf32, #tpu.memory_space<vmem>>, %arg5: memref<4x3x32xf32, #tpu.memory_space<vmem>>) attributes {dimension_semantics = [#tpu.dimension_semantics<parallel>, #tpu.dimension_semantics<parallel>], iteration_bounds = array<i64: 2, 1>, scalar_prefetch = 0 : i64, scratch_operands = 0 : i64, tpu.core_type = #tpu.core_type<tc>, window_params = [{transform_indices = @transform_0, window_bounds = array<i64: 4, 3, 8>}, {pipeline_mode = #tpu.pipeline_mode<synchronous>, transform_indices = @transform_1, window_bounds = array<i64: 8, 32>}, {transform_indices = @transform_2, window_bounds = array<i64: 3, 32>}, {transform_indices = @transform_3, window_bounds = array<i64: 4, 3, 32>}]} {
    %c0 = arith.constant 0 : index
    %c0_0 = arith.constant 0 : index
    %0 = vector.load %arg3[%c0, %c0_0] : memref<8x32xf32, #tpu.memory_space<vmem>>, vector<8x32xf32>
    %c0_1 = arith.constant 0 : index
    %c0_2 = arith.constant 0 : index
    %1 = vector.load %arg4[%c0_1, %c0_2] : memref<3x32xf32, #tpu.memory_space<vmem>>, vector<3x32xf32>
    %c0_i32 = arith.constant 0 : i32
    %2 = arith.index_cast %c0_i32 : i32 to index
    %c0_3 = arith.constant 0 : index
    %c0_4 = arith.constant 0 : index
    %3 = vector.load %arg2[%2, %c0_3, %c0_4] : memref<4x3x8xf32, #tpu.memory_space<vmem>>, vector<1x3x8xf32>
    %4 = vector.shape_cast %3 : vector<1x3x8xf32> to vector<3x8xf32>
    %cst = arith.constant dense<0.000000e+00> : vector<3x32xf32>
    %5 = tpu.matmul %4, %0, %cst {dimension_numbers = #tpu.dot_dimension_numbers<[1], [0], [0], [1], [0, 0, 1, 1], [], []>} : vector<3x8xf32>, vector<8x32xf32>, vector<3x32xf32> -> vector<3x32xf32>
    %6 = arith.addf %5, %1 : vector<3x32xf32>
    %7 = arith.index_cast %c0_i32 : i32 to index
    %c0_5 = arith.constant 0 : index
    %c0_6 = arith.constant 0 : index
    %8 = vector.load %arg5[%7, %c0_5, %c0_6] : memref<4x3x32xf32, #tpu.memory_space<vmem>>, vector<1x3x32xf32>
    %9 = vector.shape_cast %8 : vector<1x3x32xf32> to vector<3x32xf32>
    %10 = vector.shape_cast %6 : vector<3x32xf32> to vector<1x3x32xf32>
    tpu.vector_store %arg5[%7, %c0_5, %c0_6], %10 {strides = array<i32>} : memref<4x3x32xf32, #tpu.memory_space<vmem>>, vector<1x3x32xf32>,
    %c1_i32 = arith.constant 1 : i32
    %11 = arith.index_cast %c1_i32 : i32 to index
    %c0_7 = arith.constant 0 : index
    %c0_8 = arith.constant 0 : index
    %12 = vector.load %arg2[%11, %c0_7, %c0_8] : memref<4x3x8xf32, #tpu.memory_space<vmem>>, vector<1x3x8xf32>
    %13 = vector.shape_cast %12 : vector<1x3x8xf32> to vector<3x8xf32>
    %cst_9 = arith.constant dense<0.000000e+00> : vector<3x32xf32>
    %14 = tpu.matmul %13, %0, %cst_9 {dimension_numbers = #tpu.dot_dimension_numbers<[1], [0], [0], [1], [0, 0, 1, 1], [], []>} : vector<3x8xf32>, vector<8x32xf32>, vector<3x32xf32> -> vector<3x32xf32>
    %15 = arith.addf %14, %1 : vector<3x32xf32>
    %16 = arith.index_cast %c1_i32 : i32 to index
    %c0_10 = arith.constant 0 : index
    %c0_11 = arith.constant 0 : index
    %17 = vector.load %arg5[%16, %c0_10, %c0_11] : memref<4x3x32xf32, #tpu.memory_space<vmem>>, vector<1x3x32xf32>
    %18 = vector.shape_cast %17 : vector<1x3x32xf32> to vector<3x32xf32>
    %19 = vector.shape_cast %15 : vector<3x32xf32> to vector<1x3x32xf32>
    tpu.vector_store %arg5[%16, %c0_10, %c0_11], %19 {strides = array<i32>} : memref<4x3x32xf32, #tpu.memory_space<vmem>>, vector<1x3x32xf32>,
    %c2_i32 = arith.constant 2 : i32
    %20 = arith.index_cast %c2_i32 : i32 to index
    %c0_12 = arith.constant 0 : index
    %c0_13 = arith.constant 0 : index
    %21 = vector.load %arg2[%20, %c0_12, %c0_13] : memref<4x3x8xf32, #tpu.memory_space<vmem>>, vector<1x3x8xf32>
    %22 = vector.shape_cast %21 : vector<1x3x8xf32> to vector<3x8xf32>
    %cst_14 = arith.constant dense<0.000000e+00> : vector<3x32xf32>
    %23 = tpu.matmul %22, %0, %cst_14 {dimension_numbers = #tpu.dot_dimension_numbers<[1], [0], [0], [1], [0, 0, 1, 1], [], []>} : vector<3x8xf32>, vector<8x32xf32>, vector<3x32xf32> -> vector<3x32xf32>
    %24 = arith.addf %23, %1 : vector<3x32xf32>
    %25 = arith.index_cast %c2_i32 : i32 to index
    %c0_15 = arith.constant 0 : index
    %c0_16 = arith.constant 0 : index
    %26 = vector.load %arg5[%25, %c0_15, %c0_16] : memref<4x3x32xf32, #tpu.memory_space<vmem>>, vector<1x3x32xf32>
    %27 = vector.shape_cast %26 : vector<1x3x32xf32> to vector<3x32xf32>
    %28 = vector.shape_cast %24 : vector<3x32xf32> to vector<1x3x32xf32>
    tpu.vector_store %arg5[%25, %c0_15, %c0_16], %28 {strides = array<i32>} : memref<4x3x32xf32, #tpu.memory_space<vmem>>, vector<1x3x32xf32>,
    %c3_i32 = arith.constant 3 : i32
    %29 = arith.index_cast %c3_i32 : i32 to index
    %c0_17 = arith.constant 0 : index
    %c0_18 = arith.constant 0 : index
    %30 = vector.load %arg2[%29, %c0_17, %c0_18] : memref<4x3x8xf32, #tpu.memory_space<vmem>>, vector<1x3x8xf32>
    %31 = vector.shape_cast %30 : vector<1x3x8xf32> to vector<3x8xf32>
    %cst_19 = arith.constant dense<0.000000e+00> : vector<3x32xf32>
    %32 = tpu.matmul %31, %0, %cst_19 {dimension_numbers = #tpu.dot_dimension_numbers<[1], [0], [0], [1], [0, 0, 1, 1], [], []>} : vector<3x8xf32>, vector<8x32xf32>, vector<3x32xf32> -> vector<3x32xf32>
    %33 = arith.addf %32, %1 : vector<3x32xf32>
    %34 = arith.index_cast %c3_i32 : i32 to index
    %c0_20 = arith.constant 0 : index
    %c0_21 = arith.constant 0 : index
    %35 = vector.load %arg5[%34, %c0_20, %c0_21] : memref<4x3x32xf32, #tpu.memory_space<vmem>>, vector<1x3x32xf32>
    %36 = vector.shape_cast %35 : vector<1x3x32xf32> to vector<3x32xf32>
    %37 = vector.shape_cast %33 : vector<3x32xf32> to vector<1x3x32xf32>
    tpu.vector_store %arg5[%34, %c0_20, %c0_21], %37 {strides = array<i32>} : memref<4x3x32xf32, #tpu.memory_space<vmem>>, vector<1x3x32xf32>,
    %c4_i32 = arith.constant 4 : i32
    return
  }
  func.func @transform_0(%arg0: i32, %arg1: i32) -> (i32, i32, i32) {
    %c0_i32 = arith.constant 0 : i32
    %c0_i32_0 = arith.constant 0 : i32
    return %arg0, %arg1, %c0_i32 : i32, i32, i32
  }
  func.func @transform_1(%arg0: i32, %arg1: i32) -> (i32, i32) {
    %c0_i32 = arith.constant 0 : i32
    %c0_i32_0 = arith.constant 0 : i32
    %c0_i32_1 = arith.constant 0 : i32
    return %c0_i32, %c0_i32_0 : i32, i32
  }
  func.func @transform_2(%arg0: i32, %arg1: i32) -> (i32, i32) {
    %c0_i32 = arith.constant 0 : i32
    %c0_i32_0 = arith.constant 0 : i32
    return %arg1, %c0_i32 : i32, i32
  }
  func.func @transform_3(%arg0: i32, %arg1: i32) -> (i32, i32, i32) {
    %c0_i32 = arith.constant 0 : i32
    %c0_i32_0 = arith.constant 0 : i32
    return %arg0, %arg1, %c0_i32 : i32, i32, i32
  }
}

</mosaic_0001>

<bundles_post_ra>
// kernel: tpu_custom_call.1
= control target key start
LH: loop header
LB: loop body
LE: loop exit
PB: predicated region body
PF: predicated region fallthrough
CT: control target
= control target key end

     0   :  { %s747_s12 = smov 0   ;;  %s749_s13 = smov 0   ;;  %s790_s0 = inlined_call_operand.vmem [shape: f32[8,3,8], index: 0, kind: input, shape index: {}]   ;;  %s791_s1 = inlined_call_operand.vmem [shape: f32[8,32], index: 1, kind: input, shape index: {}]   ;;  %s792_s2 = inlined_call_operand.vmem [shape: f32[3,32], index: 2, kind: input, shape index: {}]   ;;  %s793_s3 = inlined_call_operand.vmem [shape: f32[8,3,32], index: 3, kind: output, shape index: {}]  }
   0x1   :  { %s751_s14 = smov 0  }
   0x2 LB: > { %s25_s15 = sadd.s32 1, %s719_s13  ;;  %p630_p0 = scmp.ge.s32.totalorder %s723_s14, 1  ;;  %s723_s14 = sphi %s751_s14, %s13_s14   ;;  %s719_s13 = sphi %s749_s13, %s795_s13   ;;  %s715_s12 = sphi %s747_s12, %s794_s12  }
   0x3   : > { %p27_p1 = scmp.ge.s32.totalorder %s25_s15, 2  ;;  %p166_p2 = scmp.lt.s32.totalorder %s723_s14, 3 }
   0x5   : > { %s797_s15 = smov (%p27_p1, %s25_s15), 0  ;;  %p167_p3 = pnand %p630_p0, %p166_p2 }
   0x6   : > { %v222_v0 = vld [vmem:[%s791_s1] sm:$0xff] (!%p167_p3)  ;;  %s631_s18 = sshll.u32 (!%p167_p3), %s715_s12, 2  ;;  %v725_v1 = vmov (!%p167_p3), 0.0   ;;  %vm726_vm0 = vmmov (!%p167_p3), 0   ;;  %vm225_vm1 = vcmask (!%p167_p3), 64512   ;;  %vm299_vm2 = vcmask (!%p167_p3), 256000  }
   0x7   : > { %170 = sbr.rel (%p167_p3) target bundleno = 237 (0xed), region = 32  ;;  %655 = vmatprep.subr.mxu0 (!%p167_p3), %v725_v1  ;;  %660 = vmatprep.subr.mxu1 (!%p167_p3), %v725_v1  ;;  %p201_p4 = scmp.lt.s32.totalorder (!%p167_p3), %s631_s18, 7  ;;  %v223_v6 = vld [vmem:[%s792_s2] sm:$0x7] (!%p167_p3) }
   0x8   : > { %656 = vmatpush3.msra.mxu0 (!%p167_p3), %v222_v0  ;;  %657 = vmatprep.mubr.msk.f32.mxu0 (!%p167_p3), %vm726_vm0, %v725_v1 }
   0x9   : > { %661 = vmatpush3.msra.mxu1 (!%p167_p3), %v222_v0  ;;  %662 = vmatprep.mubr.msk.f32.mxu1 (!%p167_p3), %vm726_vm0, %v725_v1 }
   0xa   : > { %665 = vmatprep.subr.mxu0 (!%p167_p3), %v725_v1  ;;  %670 = vmatprep.subr.mxu1 (!%p167_p3), %v725_v1 }
   0xe   : > { %s799_s18 = smov (!%p201_p4, %s631_s18), 7 }
   0xf   : > { %s632_s19 = sshll.u32 %s799_s18, 2 }
  0x10   : > { %s207_s22 = scalar_lea.vmem %s790_s0, %s632_s19  ;;  %s220_s27 = scalar_lea.vmem %s793_s3, %s632_s19 }
  0x11   : > { %v224_v2 = vld [vmem:[%s207_s22] sm:$0x7]  ;;  %v636_v3 = vld [vmem:[%s207_s22 + $0x4] sm:$0x7]  ;;  %v639_v4 = vld [vmem:[%s207_s22 + $0x8] sm:$0x7] }
  0x12   : > { %658 = vmatmul.mubr.msk.f32.vlgmr.msra.gmra.mrb[0].mxu0 %vm225_vm1, %v224_v2  ;;  %663 = vmatmul.mubr.msk.f32.vlgmr.msra.gmra.mrb[0].mxu1 %vm225_vm1, %v636_v3  ;;  %v642_v5 = vld [vmem:[%s207_s22 + $0xc] sm:$0x7] }
  0x13   : > { %666 = vmatpush3.msra.mxu0 %v222_v0  ;;  %671 = vmatpush3.msra.mxu1 %v222_v0 }
  0x14   : > { %667 = vmatprep.mubr.msk.f32.mxu0 %vm726_vm0, %v725_v1  ;;  %672 = vmatprep.mubr.msk.f32.mxu1 %vm726_vm0, %v725_v1 }
  0x16   : > { %668 = vmatmul.mubr.msk.f32.vlgmr.msra.gmra.mrb[2].mxu0 %vm225_vm1, %v639_v4  ;;  %673 = vmatmul.mubr.msk.f32.vlgmr.msra.gmra.mrb[2].mxu1 %vm225_vm1, %v642_v5 }
  0xe5   : > { %v295_v7 = vpop.f32.mrb[0].mxu0  ;;  %v372_v8 = vpop.f32.mrb[0].mxu1 }
  0xe6   : > { %v296_v9 = vadd.f32 %v295_v7, %v223_v6  ;;  %v373_v10 = vadd.f32 %v372_v8, %v223_v6  ;;  %v659_v11 = vpop.f32.mrb[1].mxu0  ;;  %v664_v12 = vpop.f32.mrb[1].mxu1 }
  0xe8   : > { %300 = vst.msk [vmem:[%s220_s27] sm:$0x7] %vm299_vm2, %v296_v9  ;;  %638 = vst.msk [vmem:[%s220_s27 + $0x4] sm:$0x7] %vm299_vm2, %v373_v10 }
  0xe9   : > { %v449_v13 = vpop.f32.mrb[2].mxu0  ;;  %v526_v14 = vpop.f32.mrb[2].mxu1 }
  0xea   : > { %v450_v15 = vadd.f32 %v449_v13, %v223_v6  ;;  %v527_v16 = vadd.f32 %v526_v14, %v223_v6  ;;  %v669_v17 = vpop.f32.mrb[3].mxu0  ;;  %v674_v18 = vpop.f32.mrb[3].mxu1 }
  0xec   : > { %641 = vst.msk [vmem:[%s220_s27 + $0x8] sm:$0x7] %vm299_vm2, %v450_v15  ;;  %644 = vst.msk [vmem:[%s220_s27 + $0xc] sm:$0x7] %vm299_vm2, %v527_v16 }
  0xed PF: > { %s13_s14 = sadd.s32 1, %s723_s14   ;;  %s794_s12 = smov %s719_s13 }
  0xee   : > { %p10_p5 = scmp.ge.s32.totalorder %s13_s14, 4   ;;  %s795_s13 = smov %s797_s15 }
  0xf0   :  { %12 = sbr.rel (!%p10_p5) target bundleno = 2 (0x2), region = 71 }

</bundles_post_ra>
